<compile_context>
chip_gen: v7x
topology: tpu7x:2x2x1
jax: 0.10.0
libtpu: 0.0.40
codegen_flags: <defaults>
</compile_context>

<pallas_src>
import jax
import jax.numpy as jnp
from jax.experimental import pallas as pl
from jax.experimental.pallas import tpu as pltpu


def _round_up(n, m):
    return ((n + m - 1) // m) * m


def _cdiv(a, b):
    return (a + b - 1) // b


def mlp_kernel(x_ref, w1_ref, b1_ref, w2_ref, b2_ref, w3_ref, b3_ref, o_ref, h1_acc):
    """One (batch-tile, K-tile) grid step.

    Layer-1 partial products are accumulated over the K grid axis into an f32
    VMEM scratch (initialized to the broadcast layer-1 bias); ReLU and layers
    2/3 run once on the final K step.
    """
    k = pl.program_id(1)

    @pl.when(k == 0)
    def _init():
        # Fold b1 into the accumulator init (saves one epilogue VPU add).
        h1_acc[...] = jnp.broadcast_to(b1_ref[...], h1_acc.shape)

    # Layer 1 partial product: (B_TILE, TILE_K)bf16 @ (TILE_K, H1)bf16 -> f32 acc.
    h1_acc[...] += jnp.dot(x_ref[...], w1_ref[...],
                           preferred_element_type=jnp.float32)

    @pl.when(k == pl.num_programs(1) - 1)
    def _finalize():
        # Layer 1 epilogue: ReLU (bias already folded in; Dropout == identity in eval).
        h1 = jnp.maximum(h1_acc[...], 0.0)
        # Layer 2: Linear + ReLU (Dropout == identity in eval mode).
        h2 = jnp.dot(h1.astype(w2_ref.dtype), w2_ref[...],
                     preferred_element_type=jnp.float32)
        h2 = jnp.maximum(h2 + b2_ref[...], 0.0)
        # Layer 3: Linear (logits), lane-dense padded output.
        out = jnp.dot(h2.astype(w3_ref.dtype), w3_ref[...],
                      preferred_element_type=jnp.float32) + b3_ref[...]
        o_ref[...] = out.astype(o_ref.dtype)


def prepare_mlp_params(params, *, k_tile=4096, compute_dtype=jnp.bfloat16):
    """Pad + cast the weights ONCE (hoisted out of the per-call forward path).

    params: (w1, b1, w2, b2, w3, b3) with w_i stored (in, out) so y = x @ W + b
    matches PyTorch's x @ W_pt.T + b.
    """
    w1, b1, w2, b2, w3, b3 = params
    K, H1 = w1.shape
    H2 = w2.shape[1]
    N = w3.shape[1]

    tile_k = min(k_tile, _round_up(K, 128))
    K_pad = _round_up(K, tile_k)
    H1p = _round_up(H1, 128)
    H2p = _round_up(H2, 128)
    Np = _round_up(N, 128)                    # lane-dense output

    def pad2(a, rows, cols):
        return jnp.pad(a, ((0, rows - a.shape[0]), (0, cols - a.shape[1])))

    prepared = {
        # bf16 weight stream (halves HBM bytes); biases stay f32.
        "w1": pad2(w1, K_pad, H1p).astype(compute_dtype),
        "w2": pad2(w2, H1p, H2p).astype(compute_dtype),
        "w3": pad2(w3, H2p, Np).astype(compute_dtype),
        "b1": pad2(b1.reshape(1, -1), 1, H1p).astype(jnp.float32),
        "b2": pad2(b2.reshape(1, -1), 1, H2p).astype(jnp.float32),
        "b3": pad2(b3.reshape(1, -1), 1, Np).astype(jnp.float32),
        "K": K, "N": N, "tile_k": tile_k, "K_pad": K_pad,
        "H1p": H1p, "H2p": H2p, "Np": Np,
        "compute_dtype": compute_dtype,
    }
    # Materialize now so repeated forwards never re-pay the pad/cast.
    for key in ("w1", "w2", "w3", "b1", "b2", "b3"):
        prepared[key] = jax.block_until_ready(prepared[key])
    return prepared


def mlp_forward(x_nchw, prepared, *, b_tile=None):
    """x_nchw: (B, C, H, W) float32. Returns (B, num_classes) float32 logits."""
    B = x_nchw.shape[0]
    x = x_nchw.reshape(B, -1).astype(jnp.float32)         # nn.Flatten()
    K = prepared["K"]
    assert x.shape[1] == K, (x.shape, K)

    N = prepared["N"]
    tile_k = prepared["tile_k"]
    K_pad = prepared["K_pad"]
    H1p, H2p, Np = prepared["H1p"], prepared["H2p"], prepared["Np"]
    cd = prepared["compute_dtype"]

    # ---- batch tiling (lane = 128; 16-row multiple for bf16 sublane packing) ----
    if b_tile is None:
        if B < 32:
            b_tile = min(256, _round_up(B, 16))
        else:
            # >= 2 batch tiles so the "parallel" axis feeds both v7x TensorCores;
            # <= 256 rows/tile fills the 256-wide MXU on v6e/v7x and bounds VMEM.
            b_tile = min(256, _round_up(_cdiv(_round_up(B, 16), 2), 16))
    B_pad = _round_up(B, b_tile)

    xp = jnp.pad(x, ((0, B_pad - B), (0, K_pad - K))).astype(cd)

    grid = (B_pad // b_tile, K_pad // tile_k)

    in_specs = [
        pl.BlockSpec((b_tile, tile_k), lambda b, k: (b, k)),   # x tile
        pl.BlockSpec((tile_k, H1p),    lambda b, k: (k, 0)),   # w1 tile (K-streamed)
        pl.BlockSpec((1, H1p),         lambda b, k: (0, 0)),   # b1
        pl.BlockSpec((H1p, H2p),       lambda b, k: (0, 0)),   # w2 (resident)
        pl.BlockSpec((1, H2p),         lambda b, k: (0, 0)),   # b2
        pl.BlockSpec((H2p, Np),        lambda b, k: (0, 0)),   # w3 (resident)
        pl.BlockSpec((1, Np),          lambda b, k: (0, 0)),   # b3
    ]
    out_specs = pl.BlockSpec((b_tile, Np), lambda b, k: (b, 0))

    # VMEM budget: double-buffered streamed tiles + resident layer-2/3 weights
    # + accumulator scratch + output tile.  Capped by the physical per-core VMEM
    # (queried; fallback 64 MiB == v7x per-TensorCore capacity).
    itemsize = jnp.dtype(cd).itemsize
    vmem_bytes = (
        2 * b_tile * tile_k * itemsize        # x tile (double-buffered)
        + 2 * tile_k * H1p * itemsize         # w1 tile (double-buffered)
        + 2 * H1p * H2p * itemsize            # w2
        + 2 * H2p * Np * itemsize             # w3
        + 2 * 4 * (H1p + H2p + Np)            # biases (f32)
        + b_tile * H1p * 4                    # h1 accumulator scratch
        + 2 * b_tile * Np * 4                 # output tile
    )
    try:
        vmem_cap = int(getattr(pltpu.get_tpu_info(), "vmem_capacity_bytes", 64 << 20))
    except Exception:
        vmem_cap = 64 << 20
    vmem_limit = int(min(vmem_cap, max(32 << 20, vmem_bytes + (8 << 20))))

    out_padded = pl.pallas_call(
        mlp_kernel,
        out_shape=jax.ShapeDtypeStruct((B_pad, Np), jnp.float32),
        grid_spec=pltpu.PrefetchScalarGridSpec(
            num_scalar_prefetch=0,
            grid=grid,
            in_specs=in_specs,
            out_specs=out_specs,
            scratch_shapes=[pltpu.VMEM((b_tile, H1p), jnp.float32)],
        ),
        compiler_params=pltpu.CompilerParams(
            dimension_semantics=("parallel", "arbitrary"),
            vmem_limit_bytes=vmem_limit,
        ),
    )(xp, prepared["w1"], prepared["b1"], prepared["w2"], prepared["b2"],
      prepared["w3"], prepared["b3"])

    return out_padded[:B, :N]


def init_params(key, input_size, hidden1, hidden2, num_classes):
    """nn.Linear-style init: U(-1/sqrt(fan_in), 1/sqrt(fan_in)); weights (in, out)."""
    def linear(k, fan_in, fan_out):
        kw, kb = jax.random.split(k)
        bound = 1.0 / jnp.sqrt(fan_in)
        w = jax.random.uniform(kw, (fan_in, fan_out), jnp.float32, -bound, bound)
        b = jax.random.uniform(kb, (fan_out,), jnp.float32, -bound, bound)
        return w, b

    k1, k2, k3 = jax.random.split(key, 3)
    w1, b1 = linear(k1, input_size, hidden1)
    w2, b2 = linear(k2, hidden1, hidden2)
    w3, b3 = linear(k3, hidden2, num_classes)
    return (w1, b1, w2, b2, w3, b3)


if __name__ == "__main__":
    # Small shapes consistent with the module: 1-channel 16x16 "image".
    B, C, H, W = 2, 1, 16, 16
    input_size = C * H * W          # 256  (module default is 1*227*227)
    hidden1, hidden2, num_classes = 512, 256, 10

    key = jax.random.PRNGKey(0)
    kx, kp = jax.random.split(key)
    x = jax.random.normal(kx, (B, C, H, W), dtype=jnp.float32)
    params = init_params(kp, input_size, hidden1, hidden2, num_classes)

    prepared = prepare_mlp_params(params)          # pad/cast ONCE, off the hot path
    logits = mlp_forward(x, prepared)
    jax.block_until_ready(logits)
    assert logits.shape == (B, num_classes)

    # Reference with the same bf16-quantized operands (f32 math) — mirrors the
    # kernel's bf16 weight/activation stream with f32 accumulation.
    w1, b1, w2, b2, w3, b3 = params
    bf = jnp.bfloat16
    q = lambda a: a.astype(bf).astype(jnp.float32)
    xf = x.reshape(B, -1)
    h1 = jnp.maximum(q(xf) @ q(w1) + b1, 0.0)
    h2 = jnp.maximum(q(h1) @ q(w2) + b2, 0.0)
    ref = q(h2) @ q(w3) + b3
    assert jnp.allclose(logits, ref, atol=1e-2, rtol=1e-2), (
        float(jnp.max(jnp.abs(logits - ref))))

    print("KERNEL_OK")
</pallas_src>

<mosaic_0001>
module attributes {stable_mosaic.version = 11 : i64} {
  func.func @mlp_kernel(%arg0: i32, %arg1: i32, %arg2: memref<16x256xbf16, #tpu.memory_space<vmem>>, %arg3: memref<256x512xbf16, #tpu.memory_space<vmem>>, %arg4: memref<1x512xf32, #tpu.memory_space<vmem>>, %arg5: memref<512x256xbf16, #tpu.memory_space<vmem>>, %arg6: memref<1x256xf32, #tpu.memory_space<vmem>>, %arg7: memref<256x128xbf16, #tpu.memory_space<vmem>>, %arg8: memref<1x128xf32, #tpu.memory_space<vmem>>, %arg9: memref<16x128xf32, #tpu.memory_space<vmem>>, %arg10: memref<16x512xf32, #tpu.memory_space<vmem>>) attributes {dimension_semantics = [#tpu.dimension_semantics<parallel>, #tpu.dimension_semantics<arbitrary>], iteration_bounds = array<i64: 1, 1>, scalar_prefetch = 0 : i64, scratch_operands = 1 : i64, tpu.core_type = #tpu.core_type<tc>, window_params = [{transform_indices = @transform_0, window_bounds = array<i64: 16, 256>}, {transform_indices = @transform_1, window_bounds = array<i64: 256, 512>}, {pipeline_mode = #tpu.pipeline_mode<synchronous>, transform_indices = @transform_2, window_bounds = array<i64: 1, 512>}, {pipeline_mode = #tpu.pipeline_mode<synchronous>, transform_indices = @transform_3, window_bounds = array<i64: 512, 256>}, {pipeline_mode = #tpu.pipeline_mode<synchronous>, transform_indices = @transform_4, window_bounds = array<i64: 1, 256>}, {pipeline_mode = #tpu.pipeline_mode<synchronous>, transform_indices = @transform_5, window_bounds = array<i64: 256, 128>}, {pipeline_mode = #tpu.pipeline_mode<synchronous>, transform_indices = @transform_6, window_bounds = array<i64: 1, 128>}, {transform_indices = @transform_7, window_bounds = array<i64: 16, 128>}]} {
    %c0_i32 = arith.constant 0 : i32
    %0 = arith.cmpi eq, %arg1, %c0_i32 : i32
    %1 = arith.extui %0 : i1 to i32
    %c0_i32_0 = arith.constant 0 : i32
    %2 = arith.cmpi ne, %1, %c0_i32_0 : i32
    scf.if %2 {
      %c0_10 = arith.constant 0 : index
      %c0_11 = arith.constant 0 : index
      %12 = vector.load %arg4[%c0_10, %c0_11] : memref<1x512xf32, #tpu.memory_space<vmem>>, vector<1x512xf32>
      %13 = vector.shape_cast %12 : vector<1x512xf32> to vector<1x512xf32>
      %14 = vector.broadcast %13 : vector<1x512xf32> to vector<16x512xf32>
      %c0_12 = arith.constant 0 : index
      %c0_13 = arith.constant 0 : index
      %15 = vector.load %arg10[%c0_12, %c0_13] : memref<16x512xf32, #tpu.memory_space<vmem>>, vector<16x512xf32>
      tpu.vector_store %arg10[%c0_12, %c0_13], %14 {strides = array<i32>} : memref<16x512xf32, #tpu.memory_space<vmem>>, vector<16x512xf32>,
    } else {
    }
    %c0 = arith.constant 0 : index
    %c0_1 = arith.constant 0 : index
    %3 = vector.load %arg10[%c0, %c0_1] : memref<16x512xf32, #tpu.memory_space<vmem>>, vector<16x512xf32>
    %c0_2 = arith.constant 0 : index
    %c0_3 = arith.constant 0 : index
    %4 = vector.load %arg2[%c0_2, %c0_3] : memref<16x256xbf16, #tpu.memory_space<vmem>>, vector<16x256xbf16>
    %c0_4 = arith.constant 0 : index
    %c0_5 = arith.constant 0 : index
    %5 = vector.load %arg3[%c0_4, %c0_5] : memref<256x512xbf16, #tpu.memory_space<vmem>>, vector<256x512xbf16>
    %cst = arith.constant dense<0.000000e+00> : vector<16x512xf32>
    %6 = tpu.matmul %4, %5, %cst {dimension_numbers = #tpu.dot_dimension_numbers<[1], [0], [0], [1], [0, 0, 1, 1], [], []>} : vector<16x256xbf16>, vector<256x512xbf16>, vector<16x512xf32> -> vector<16x512xf32>
    %7 = arith.addf %3, %6 : vector<16x512xf32>
    %c0_6 = arith.constant 0 : index
    %c0_7 = arith.constant 0 : index
    %8 = vector.load %arg10[%c0_6, %c0_7] : memref<16x512xf32, #tpu.memory_space<vmem>>, vector<16x512xf32>
    tpu.vector_store %arg10[%c0_6, %c0_7], %7 {strides = array<i32>} : memref<16x512xf32, #tpu.memory_space<vmem>>, vector<16x512xf32>,
    %c0_i32_8 = arith.constant 0 : i32
    %9 = arith.cmpi eq, %arg1, %c0_i32_8 : i32
    %10 = arith.extui %9 : i1 to i32
    %c0_i32_9 = arith.constant 0 : i32
    %11 = arith.cmpi ne, %10, %c0_i32_9 : i32
    scf.if %11 {
      %c0_10 = arith.constant 0 : index
      %c0_11 = arith.constant 0 : index
      %12 = vector.load %arg10[%c0_10, %c0_11] : memref<16x512xf32, #tpu.memory_space<vmem>>, vector<16x512xf32>
      %cst_12 = arith.constant 0.000000e+00 : f32
      %13 = vector.broadcast %cst_12 : f32 to vector<16x512xf32>
      %14 = arith.maximumf %12, %13 : vector<16x512xf32>
      %15 = arith.truncf %14 : vector<16x512xf32> to vector<16x512xbf16>
      %c0_13 = arith.constant 0 : index
      %c0_14 = arith.constant 0 : index
      %16 = vector.load %arg5[%c0_13, %c0_14] : memref<512x256xbf16, #tpu.memory_space<vmem>>, vector<512x256xbf16>
      %cst_15 = arith.constant dense<0.000000e+00> : vector<16x256xf32>
      %17 = tpu.matmul %15, %16, %cst_15 {dimension_numbers = #tpu.dot_dimension_numbers<[1], [0], [0], [1], [0, 0, 1, 1], [], []>} : vector<16x512xbf16>, vector<512x256xbf16>, vector<16x256xf32> -> vector<16x256xf32>
      %c0_16 = arith.constant 0 : index
      %c0_17 = arith.constant 0 : index
      %18 = vector.load %arg6[%c0_16, %c0_17] : memref<1x256xf32, #tpu.memory_space<vmem>>, vector<1x256xf32>
      %19 = vector.broadcast %18 : vector<1x256xf32> to vector<16x256xf32>
      %20 = arith.addf %17, %19 : vector<16x256xf32>
      %cst_18 = arith.constant 0.000000e+00 : f32
      %21 = vector.broadcast %cst_18 : f32 to vector<16x256xf32>
      %22 = arith.maximumf %20, %21 : vector<16x256xf32>
      %23 = arith.truncf %22 : vector<16x256xf32> to vector<16x256xbf16>
      %c0_19 = arith.constant 0 : index
      %c0_20 = arith.constant 0 : index
      %24 = vector.load %arg7[%c0_19, %c0_20] : memref<256x128xbf16, #tpu.memory_space<vmem>>, vector<256x128xbf16>
      %cst_21 = arith.constant dense<0.000000e+00> : vector<16x128xf32>
      %25 = tpu.matmul %23, %24, %cst_21 {dimension_numbers = #tpu.dot_dimension_numbers<[1], [0], [0], [1], [0, 0, 1, 1], [], []>} : vector<16x256xbf16>, vector<256x128xbf16>, vector<16x128xf32> -> vector<16x128xf32>
      %c0_22 = arith.constant 0 : index
      %c0_23 = arith.constant 0 : index
      %26 = vector.load %arg8[%c0_22, %c0_23] : memref<1x128xf32, #tpu.memory_space<vmem>>, vector<1x128xf32>
      %27 = vector.broadcast %26 : vector<1x128xf32> to vector<16x128xf32>
      %28 = arith.addf %25, %27 : vector<16x128xf32>
      %c0_24 = arith.constant 0 : index
      %c0_25 = arith.constant 0 : index
      %29 = vector.load %arg9[%c0_24, %c0_25] : memref<16x128xf32, #tpu.memory_space<vmem>>, vector<16x128xf32>
      tpu.vector_store %arg9[%c0_24, %c0_25], %28 {strides = array<i32>} : memref<16x128xf32, #tpu.memory_space<vmem>>, vector<16x128xf32>,
    } else {
    }
    return
  }
  func.func @transform_0(%arg0: i32, %arg1: i32) -> (i32, i32) {
    %c0_i32 = arith.constant 0 : i32
    return %arg0, %arg1 : i32, i32
  }
  func.func @transform_1(%arg0: i32, %arg1: i32) -> (i32, i32) {
    %c0_i32 = arith.constant 0 : i32
    %c0_i32_0 = arith.constant 0 : i32
    return %arg1, %c0_i32 : i32, i32
  }
  func.func @transform_2(%arg0: i32, %arg1: i32) -> (i32, i32) {
    %c0_i32 = arith.constant 0 : i32
    %c0_i32_0 = arith.constant 0 : i32
    %c0_i32_1 = arith.constant 0 : i32
    return %c0_i32, %c0_i32_0 : i32, i32
  }
  func.func @transform_3(%arg0: i32, %arg1: i32) -> (i32, i32) {
    %c0_i32 = arith.constant 0 : i32
    %c0_i32_0 = arith.constant 0 : i32
    %c0_i32_1 = arith.constant 0 : i32
    return %c0_i32, %c0_i32_0 : i32, i32
  }
  func.func @transform_4(%arg0: i32, %arg1: i32) -> (i32, i32) {
    %c0_i32 = arith.constant 0 : i32
    %c0_i32_0 = arith.constant 0 : i32
    %c0_i32_1 = arith.constant 0 : i32
    return %c0_i32, %c0_i32_0 : i32, i32
  }
  func.func @transform_5(%arg0: i32, %arg1: i32) -> (i32, i32) {
    %c0_i32 = arith.constant 0 : i32
    %c0_i32_0 = arith.constant 0 : i32
    %c0_i32_1 = arith.constant 0 : i32
    return %c0_i32, %c0_i32_0 : i32, i32
  }
  func.func @transform_6(%arg0: i32, %arg1: i32) -> (i32, i32) {
    %c0_i32 = arith.constant 0 : i32
    %c0_i32_0 = arith.constant 0 : i32
    %c0_i32_1 = arith.constant 0 : i32
    return %c0_i32, %c0_i32_0 : i32, i32
  }
  func.func @transform_7(%arg0: i32, %arg1: i32) -> (i32, i32) {
    %c0_i32 = arith.constant 0 : i32
    %c0_i32_0 = arith.constant 0 : i32
    return %arg0, %c0_i32 : i32, i32
  }
}

</mosaic_0001>

<bundles_post_ra>
// kernel: tpu_custom_call.1
= control target key start
LH: loop header
LB: loop body
LE: loop exit
PB: predicated region body
PF: predicated region fallthrough
CT: control target
= control target key end

     0   :  { %12 = vsyncpa [#allocation4], 0  ;;  %s2012_s0 = inlined_call_operand.hbm [shape: bf16[16,256], index: 0, kind: input, shape index: {}]   ;;  %s2013_s1 = inlined_call_operand.hbm [shape: bf16[256,512], index: 1, kind: input, shape index: {}]   ;;  %s2014_s2 = inlined_call_operand.vmem [shape: f32[1,512], index: 2, kind: input, shape index: {}]   ;;  %s2015_s3 = inlined_call_operand.hbm [shape: bf16[512,256], index: 3, kind: input, shape index: {}]   ;;  %s2016_s4 = inlined_call_operand.vmem [shape: f32[1,256], index: 4, kind: input, shape index: {}]   ;;  %s2017_s5 = inlined_call_operand.hbm [shape: bf16[256,128], index: 5, kind: input, shape index: {}]   ;;  %s2018_s6 = inlined_call_operand.vmem [shape: f32[1,128], index: 6, kind: input, shape index: {}]   ;;  %s2019_s7 = inlined_call_operand.hbm [shape: f32[16,128], index: 7, kind: output, shape index: {}]  }
   0x1   :  { %13 = vsyncpa [#allocation7], 0 }
   0x2   :  { %14 = vsyncpa [#allocation10], 0 }
   0x3   :  { %15 = vsyncpa [#allocation5], 0  ;;  %s1848_s24 = smov [#allocation6]   ;;  %s1730_s28 = scalar_lea.hbm %s2013_s1, 8192 }
   0x4   :  { %s33_s25 = sshll.u32 %s1848_s24, 4  ;;  %p1731_p0 = scmp.ne.s32.totalorder %s2013_s1, %s1730_s28  ;;  %s34_s25 = int_to_ptr.vmem [resolvable:$true] %s33_s25 }
   0x5   :  { %p1734_p1 = scmp.lt.u32.totalorder %s1730_s28, %s2013_s1 }
   0x7   :  { %p1736_p2 = pnand %p1734_p1, %p1731_p0 }
   0x9   :  { %1739 = shalt.err (!%p1736_p2)
}
   0xa   :  { %s1740_s10 = scalar_lea.vmem %s34_s25, 8192  ;;  %p1745_p4 = scmp.lt.s32.totalorder %s34_s25, %s34_s25 }
   0xb   :  { %p1741_p3 = scmp.ne.s32.totalorder %s34_s25, %s1740_s10  ;;  %p1746_p5 = scmp.lt.s32.totalorder %s1740_s10, %s1740_s10 }
   0xd   :  { %p1747_p6 = por %p1746_p5, %p1745_p4 }
   0xf   :  { %p1748_p7 = pnand %p1747_p6, %p1741_p3 }
  0x11   :  { %1751 = shalt.err (!%p1748_p7)
}
  0x12   :  { %s1849_s11 = smov 256   ;;  %s1850_s12 = smov 16  }
  0x13   :  { %39 = dma.hbm_to_vmem [thread:$0]  %s2013_s1, 8192, %s34_s25, [#allocation7], %s1849_s11, %s1849_s11, %s1850_s12  }
  0x14   :  { %s1851_s15 = smov [#allocation3]   ;;  %s1752_s19 = scalar_lea.hbm %s2012_s0, 256 }
  0x15   :  { %s21_s16 = sshll.u32 %s1851_s15, 4  ;;  %p1753_p8 = scmp.ne.s32.totalorder %s2012_s0, %s1752_s19  ;;  %s22_s16 = int_to_ptr.vmem [resolvable:$true] %s21_s16 }
  0x16   :  { %p1756_p9 = scmp.lt.u32.totalorder %s1752_s19, %s2012_s0 }
  0x18   :  { %p1758_p10 = pnand %p1756_p9, %p1753_p8 }
  0x1a   :  { %1761 = shalt.err (!%p1758_p10)
}
  0x1b   :  { %s1762_s24 = scalar_lea.vmem %s22_s16, 256  ;;  %p1767_p12 = scmp.lt.s32.totalorder %s22_s16, %s22_s16 }
  0x1c   :  { %p1763_p11 = scmp.ne.s32.totalorder %s22_s16, %s1762_s24  ;;  %p1768_p13 = scmp.lt.s32.totalorder %s1762_s24, %s1762_s24 }
  0x1e   :  { %p1769_p0 = por %p1768_p13, %p1767_p12 }
  0x20   :  { %p1770_p1 = pnand %p1769_p0, %p1763_p11 }
  0x22   :  { %1773 = shalt.err (!%p1770_p1)
}
  0x23   :  { %s1852_s1 = smov 128   ;;  %s1853_s25 = smov 8  }
  0x24   :  { %27 = dma.hbm_to_vmem [thread:$0]  %s2012_s0, 256, %s22_s16, [#allocation4], %s1852_s1, %s1852_s1, %s1853_s25  }
  0x25   :  { %s1854_s28 = smov [#allocation8]   ;;  %s1855_s30 = smov [#allocation9]  }
  0x26   :  { %s47_s29 = sshll.u32 %s1854_s28, 4  ;;  %s61_s8 = sshll.u32 %s1855_s30, 4  ;;  %s48_s29 = int_to_ptr.vmem [resolvable:$true] %s47_s29  ;;  %s1926_s8 = int_to_ptr.vmem [resolvable:$true] %s61_s8 }
  0x27   :  { %s1774_s11 = scalar_lea.hbm %s2015_s3, 8192 }
  0x28   :  { %p1775_p2 = scmp.ne.s32.totalorder %s2015_s3, %s1774_s11  ;;  %p1778_p3 = scmp.lt.u32.totalorder %s1774_s11, %s2015_s3 }
  0x2a   :  { %p1780_p4 = pnand %p1778_p3, %p1775_p2 }
  0x2c   :  { %1783 = shalt.err (!%p1780_p4)
}
  0x2d   :  { %s1784_s0 = scalar_lea.vmem %s48_s29, 8192  ;;  %p1789_p6 = scmp.lt.s32.totalorder %s48_s29, %s48_s29 }
  0x2e   :  { %p1785_p5 = scmp.ne.s32.totalorder %s48_s29, %s1784_s0  ;;  %p1790_p7 = scmp.lt.s32.totalorder %s1784_s0, %s1784_s0 }
  0x30   :  { %p1791_p8 = por %p1790_p7, %p1789_p6 }
  0x32   :  { %p1792_p9 = pnand %p1791_p8, %p1785_p5 }
  0x34   :  { %1795 = shalt.err (!%p1792_p9)
}
  0x35   :  { %53 = dma.hbm_to_vmem [thread:$0]  %s2015_s3, 8192, %s48_s29, [#allocation7], %s1852_s1, %s1852_s1, %s1853_s25  }
  0x36   :  { %s1796_s20 = scalar_lea.hbm %s2017_s5, 2048 }
  0x37   :  { %p1797_p10 = scmp.ne.s32.totalorder %s2017_s5, %s1796_s20  ;;  %p1800_p11 = scmp.lt.u32.totalorder %s1796_s20, %s2017_s5 }
  0x39   :  { %p1802_p12 = pnand %p1800_p11, %p1797_p10 }
  0x3b   :  { %1805 = shalt.err (!%p1802_p12)
}
  0x3c   :  { %s1806_s26 = scalar_lea.vmem %s1926_s8, 2048  ;;  %p1811_p0 = scmp.lt.s32.totalorder %s1926_s8, %s1926_s8 }
  0x3d   :  { %p1807_p13 = scmp.ne.s32.totalorder %s1926_s8, %s1806_s26  ;;  %p1812_p1 = scmp.lt.s32.totalorder %s1806_s26, %s1806_s26 }
  0x3f   :  { %p1813_p2 = por %p1812_p1, %p1811_p0 }
  0x41   :  { %p1814_p3 = pnand %p1813_p2, %p1807_p13 }
  0x43   :  { %1817 = shalt.err (!%p1814_p3)
}
  0x44   :  { %s1856_s3 = smov 64   ;;  %s1857_s27 = smov 4  }
  0x45   :  { %67 = dma.hbm_to_vmem [thread:$0]  %s2017_s5, 2048, %s1926_s8, [#allocation10], %s1856_s3, %s1856_s3, %s1857_s27  }
  0x46   :  { %1840 = dma.done.wait [#allocation4], 256  }
  0x47   :  { %1841 = vsyncadd [#allocation4], 4294967040 }
  0x48   :  { %1842 = dma.done.wait [#allocation7], 16384  }
  0x49   :  { %1843 = vsyncadd [#allocation7], 4294950912 }
  0x4a   :  { %1844 = dma.done.wait [#allocation10], 2048  }
  0x4b   :  { %1845 = vsyncadd [#allocation10], 4294965248  ;;  %v1519_v0 = vld [vmem:[#allocation6 + $0x4] ss:$16 sps:$4 sm:$0xff]   ;;  %v1521_v1 = vld [vmem:[#allocation6] ss:$16 sps:$4 sm:$0xff]  }
  0x4c   :  { %521 = vmatprep.subr.bf16.mxu1 %v1519_v0  ;;  %v1522_v2 = vld [vmem:[#allocation6 + $0x24] ss:$16 sps:$4 sm:$0xff]   ;;  %v1524_v3 = vld [vmem:[#allocation6 + $0x20] ss:$16 sps:$4 sm:$0xff]   ;;  %v1572_v42 = vld [vmem:[#allocation6 + $0xc] ss:$16 sps:$4 sm:$0xff]  }
  0x4d   :  { %522 = vmatpush1.bf16.msra.mxu1 %v1521_v1  ;;  %v1525_v4 = vld [vmem:[#allocation6 + $0x44] ss:$16 sps:$4 sm:$0xff]   ;;  %v1527_v5 = vld [vmem:[#allocation6 + $0x40] ss:$16 sps:$4 sm:$0xff]   ;;  %v1570_v46 = vld [vmem:[#allocation6 + $0x8] ss:$16 sps:$4 sm:$0xff]  }
  0x4e   :  { %523 = vmatprep.subr.bf16.mxu1 %v1522_v2  ;;  %v1528_v6 = vld [vmem:[#allocation6 + $0x64] ss:$16 sps:$4 sm:$0xff]   ;;  %v1530_v7 = vld [vmem:[#allocation6 + $0x60] ss:$16 sps:$4 sm:$0xff]   ;;  %v1575_v47 = vld [vmem:[#allocation6 + $0x2c] ss:$16 sps:$4 sm:$0xff]  }
  0x4f   :  { %v1531_v8 = vld [vmem:[#allocation6 + $0x84] ss:$16 sps:$4 sm:$0xff]   ;;  %v1533_v9 = vld [vmem:[#allocation6 + $0x80] ss:$16 sps:$4 sm:$0xff]   ;;  %v1573_v50 = vld [vmem:[#allocation6 + $0x28] ss:$16 sps:$4 sm:$0xff]  }
  0x50   :  { %v1534_v10 = vld [vmem:[#allocation6 + $0xa4] ss:$16 sps:$4 sm:$0xff]   ;;  %v1536_v11 = vld [vmem:[#allocation6 + $0xa0] ss:$16 sps:$4 sm:$0xff]   ;;  %v1578_v51 = vld [vmem:[#allocation6 + $0x4c] ss:$16 sps:$4 sm:$0xff]  }
  0x51   :  { %524 = vmatpush1.bf16.msra.mxu1 %v1524_v3  ;;  %v1537_v12 = vld [vmem:[#allocation6 + $0xc4] ss:$16 sps:$4 sm:$0xff]   ;;  %v1539_v14 = vld [vmem:[#allocation6 + $0xc0] ss:$16 sps:$4 sm:$0xff]   ;;  %v1576_v54 = vld [vmem:[#allocation6 + $0x48] ss:$16 sps:$4 sm:$0xff]  }
  0x52   :  { %525 = vmatprep.subr.bf16.mxu1 %v1525_v4  ;;  %v1960_v13 = vld [vmem:[#allocation3 + $0x4] ss:$8 sps:$4 sm:$0xff]   ;;  %v1542_v16 = vld [vmem:[#allocation6 + $0xe0] ss:$16 sps:$4 sm:$0xff]   ;;  %v1618_v26 = vld [vmem:[#allocation8 + $0x4] ss:$8 sps:$4 sm:$0xff]  }
  0x53   :  { %v1540_v15 = vld [vmem:[#allocation6 + $0xe4] ss:$16 sps:$4 sm:$0xff]   ;;  %553 = vmatprep.mubr.bf16.mxu1 %v1960_v13  ;;  %v1545_v18 = vld [vmem:[#allocation6 + $0x100] ss:$16 sps:$4 sm:$0xff]   ;;  %1042 = vmatprep.subr.bf16.mxu0 %v1618_v26  ;;  %v1581_v55 = vld [vmem:[#allocation6 + $0x6c] ss:$16 sps:$4 sm:$0xff]  }
  0x54   :  { %v1543_v17 = vld [vmem:[#allocation6 + $0x104] ss:$16 sps:$4 sm:$0xff]   ;;  %v1548_v20 = vld [vmem:[#allocation6 + $0x120] ss:$16 sps:$4 sm:$0xff]   ;;  %v1579_v58 = vld [vmem:[#allocation6 + $0x68] ss:$16 sps:$4 sm:$0xff]  }
  0x55   :  { %526 = vmatpush1.bf16.msra.mxu1 %v1527_v5  ;;  %v1546_v19 = vld [vmem:[#allocation6 + $0x124] ss:$16 sps:$4 sm:$0xff]   ;;  %v1551_v22 = vld [vmem:[#allocation6 + $0x140] ss:$16 sps:$4 sm:$0xff]   ;;  %v1584_v59 = vld [vmem:[#allocation6 + $0x8c] ss:$16 sps:$4 sm:$0xff]  }
  0x56   :  { %527 = vmatprep.subr.bf16.mxu1 %v1528_v6  ;;  %v1549_v21 = vld [vmem:[#allocation6 + $0x144] ss:$16 sps:$4 sm:$0xff]   ;;  %v1554_v24 = vld [vmem:[#allocation6 + $0x160] ss:$16 sps:$4 sm:$0xff]   ;;  %v1582_v62 = vld [vmem:[#allocation6 + $0x88] ss:$16 sps:$4 sm:$0xff]  }
  0x57   :  { %v1552_v23 = vld [vmem:[#allocation6 + $0x164] ss:$16 sps:$4 sm:$0xff]   ;;  %v1620_v27 = vld [vmem:[#allocation8] ss:$8 sps:$4 sm:$0xff]   ;;  %v1623_v31 = vld [vmem:[#allocation8 + $0x10] ss:$8 sps:$4 sm:$0xff]  }
  0x58   :  { %v1555_v25 = vld [vmem:[#allocation6 + $0x184] ss:$16 sps:$4 sm:$0xff]   ;;  %v1557_v28 = vld [vmem:[#allocation6 + $0x180] ss:$16 sps:$4 sm:$0xff]   ;;  %1043 = vmatpush1.bf16.msra.mxu0 %v1620_v27  ;;  %v1587_v63 = vld [vmem:[#allocation6 + $0xac] ss:$16 sps:$4 sm:$0xff]  }
  0x59   :  { %528 = vmatpush1.bf16.msra.mxu1 %v1530_v7  ;;  %v1621_v29 = vld [vmem:[#allocation8 + $0x14] ss:$8 sps:$4 sm:$0xff]   ;;  %v1624_v32 = vld [vmem:[#allocation8 + $0x24] ss:$8 sps:$4 sm:$0xff]   ;;  %v1560_v33 = vld [vmem:[#allocation6 + $0x1a0] ss:$16 sps:$4 sm:$0xff]  }
  0x5a   :  { %529 = vmatprep.subr.bf16.mxu1 %v1531_v8  ;;  %v1558_v30 = vld [vmem:[#allocation6 + $0x1a4] ss:$16 sps:$4 sm:$0xff]   ;;  %1044 = vmatprep.subr.bf16.mxu0 %v1621_v29  ;;  %v1626_v35 = vld [vmem:[#allocation8 + $0x20] ss:$8 sps:$4 sm:$0xff]   ;;  %v1629_v39 = vld [vmem:[#allocation8 + $0x30] ss:$8 sps:$4 sm:$0xff]  }
  0x5b   :  { %v1561_v34 = vld [vmem:[#allocation6 + $0x1c4] ss:$16 sps:$4 sm:$0xff]   ;;  %v1563_v37 = vld [vmem:[#allocation6 + $0x1c0] ss:$16 sps:$4 sm:$0xff]   ;;  %v1585_v2 = vld [vmem:[#allocation6 + $0xa8] ss:$16 sps:$4 sm:$0xff]  }
  0x5c   :  { %1045 = vmatpush1.bf16.msra.mxu0 %v1623_v31  ;;  %v1627_v36 = vld [vmem:[#allocation8 + $0x34] ss:$8 sps:$4 sm:$0xff]   ;;  %v1630_v40 = vld [vmem:[#allocation8 + $0x44] ss:$8 sps:$4 sm:$0xff]   ;;  %v1566_v41 = vld [vmem:[#allocation6 + $0x1e0] ss:$16 sps:$4 sm:$0xff]  }
  0x5d   :  { %530 = vmatpush1.bf16.msra.mxu1 %v1533_v9  ;;  %1046 = vmatprep.subr.bf16.mxu0 %v1624_v32  ;;  %v1564_v38 = vld [vmem:[#allocation6 + $0x1e4] ss:$16 sps:$4 sm:$0xff]   ;;  %v1632_v43 = vld [vmem:[#allocation8 + $0x40] ss:$8 sps:$4 sm:$0xff]   ;;  %v1963_v44 = vld [vmem:[#allocation3] ss:$8 sps:$4 sm:$0xff]  }
  0x5e   :  { %531 = vmatprep.subr.bf16.mxu1 %v1534_v10  ;;  %v1633_v45 = vld [vmem:[#allocation8 + $0x54] ss:$8 sps:$4 sm:$0xff]   ;;  %v1635_v48 = vld [vmem:[#allocation8 + $0x50] ss:$8 sps:$4 sm:$0xff]   ;;  %v1636_v49 = vld [vmem:[#allocation8 + $0x64] ss:$8 sps:$4 sm:$0xff]  }
  0x5f   :  { %v1638_v52 = vld [vmem:[#allocation8 + $0x60] ss:$8 sps:$4 sm:$0xff]   ;;  %v1639_v53 = vld [vmem:[#allocation8 + $0x74] ss:$8 sps:$4 sm:$0xff]   ;;  %v1641_v56 = vld [vmem:[#allocation8 + $0x70] ss:$8 sps:$4 sm:$0xff]  }
  0x60   :  { %1047 = vmatpush1.bf16.msra.mxu0 %v1626_v35  ;;  %v1642_v57 = vld [vmem:[#allocation8 + $0x84] ss:$8 sps:$4 sm:$0xff]   ;;  %v1644_v60 = vld [vmem:[#allocation8 + $0x80] ss:$8 sps:$4 sm:$0xff]   ;;  %v1645_v61 = vld [vmem:[#allocation8 + $0x94] ss:$8 sps:$4 sm:$0xff]  }
  0x61   :  { %532 = vmatpush1.bf16.msra.mxu1 %v1536_v11  ;;  %1048 = vmatprep.subr.bf16.mxu0 %v1627_v36  ;;  %v1647_v0 = vld [vmem:[#allocation8 + $0x90] ss:$8 sps:$4 sm:$0xff]   ;;  %v1648_v1 = vld [vmem:[#allocation8 + $0xa4] ss:$8 sps:$4 sm:$0xff]   ;;  %v1650_v4 = vld [vmem:[#allocation8 + $0xa0] ss:$8 sps:$4 sm:$0xff]  }
  0x62   :  { %533 = vmatprep.subr.bf16.mxu1 %v1537_v12  ;;  %v1590_v3 = vld [vmem:[#allocation6 + $0xcc] ss:$16 sps:$4 sm:$0xff]   ;;  %v1588_v6 = vld [vmem:[#allocation6 + $0xc8] ss:$16 sps:$4 sm:$0xff]   ;;  %v1714_v35 = vld [vmem:[#allocation9 + $0x40] sm:$0xff]   ;;  %s1858_s10 = smov [#allocation11]  }
  0x63   :  { %v1651_v5 = vld [vmem:[#allocation8 + $0xb4] ss:$8 sps:$4 sm:$0xff]   ;;  %v1653_v8 = vld [vmem:[#allocation8 + $0xb0] ss:$8 sps:$4 sm:$0xff]   ;;  %v1654_v9 = vld [vmem:[#allocation8 + $0xc4] ss:$8 sps:$4 sm:$0xff]  }
  0x64   :  { %1049 = vmatpush1.bf16.msra.mxu0 %v1629_v39  ;;  %v1593_v7 = vld [vmem:[#allocation6 + $0xec] ss:$16 sps:$4 sm:$0xff]   ;;  %v1591_v10 = vld [vmem:[#allocation6 + $0xe8] ss:$16 sps:$4 sm:$0xff]   ;;  %v1715_v36 = vld [vmem:[#allocation9] sm:$0xff]   ;;  %s1317_s11 = sshll.u32 %s1858_s10, 4  ;;  %s1318_s11 = int_to_ptr.vmem [resolvable:$true] %s1317_s11 }
  0x65   :  { %534 = vmatpush1.bf16.msra.mxu1 %v1539_v14  ;;  %1050 = vmatprep.subr.bf16.mxu0 %v1630_v40  ;;  %v1596_v11 = vld [vmem:[#allocation6 + $0x10c] ss:$16 sps:$4 sm:$0xff]   ;;  %v1656_v12 = vld [vmem:[#allocation8 + $0xc0] ss:$8 sps:$4 sm:$0xff]   ;;  %v1659_v29 = vld [vmem:[#allocation8 + $0xd0] ss:$8 sps:$4 sm:$0xff]   ;;  %p1823_p5 = scmp.lt.s32.totalorder %s1318_s11, %s1318_s11 }
  0x66   :  { %535 = vmatprep.subr.bf16.mxu1 %v1540_v15  ;;  %v1594_v14 = vld [vmem:[#allocation6 + $0x108] ss:$16 sps:$4 sm:$0xff]   ;;  %v1599_v15 = vld [vmem:[#allocation6 + $0x12c] ss:$16 sps:$4 sm:$0xff]   ;;  %v1718_v39 = vld [vmem:[#allocation9 + $0x50] sm:$0xff]   ;;  %s1818_s12 = scalar_lea.vmem %s1318_s11, 256 }
  0x67   :  { %v1612_v26 = vld [vmem:[#allocation6 + $0x1c8] ss:$16 sps:$4 sm:$0xff]   ;;  %v1617_v27 = vld [vmem:[#allocation6 + $0x1ec] ss:$16 sps:$4 sm:$0xff]   ;;  %v1719_v40 = vld [vmem:[#allocation9 + $0x10] sm:$0xff]   ;;  %p1819_p4 = scmp.ne.s32.totalorder %s1318_s11, %s1818_s12  ;;  %p1824_p6 = scmp.lt.s32.totalorder %s1818_s12, %s1818_s12 }
  0x68   :  { %1051 = vmatpush1.bf16.msra.mxu0 %v1632_v43  ;;  %v1662_v31 = vld [vmem:[#allocation8 + $0xe0] ss:$8 sps:$4 sm:$0xff]   ;;  %v1663_v32 = vld [vmem:[#allocation8 + $0xf4] ss:$8 sps:$4 sm:$0xff]  }
  0x69   :  { %536 = vmatpush1.bf16.msra.mxu1 %v1542_v16  ;;  %1052 = vmatprep.subr.bf16.mxu0 %v1633_v45  ;;  %v1597_v16 = vld [vmem:[#allocation6 + $0x128] ss:$16 sps:$4 sm:$0xff]   ;;  %v1722_v43 = vld [vmem:[#allocation9 + $0x60] sm:$0xff]   ;;  %p1825_p7 = por %p1824_p6, %p1823_p5 }
  0x6a   :  { %537 = vmatprep.subr.bf16.mxu1 %v1543_v17  ;;  %v1602_v17 = vld [vmem:[#allocation6 + $0x14c] ss:$16 sps:$4 sm:$0xff]  }
  0x6b   :  { %v1724_v45 = vld [vmem:[#allocation9 + $0x68] sm:$0xff]   ;;  %p1826_p8 = pnand %p1825_p7, %p1819_p4 }
  0x6c   :  { %1053 = vmatpush1.bf16.msra.mxu0 %v1635_v48 }
  0x6d   :  { %538 = vmatpush1.bf16.msra.mxu1 %v1545_v18  ;;  %1054 = vmatprep.subr.bf16.mxu0 %v1636_v49  ;;  %v1600_v18 = vld [vmem:[#allocation6 + $0x148] ss:$16 sps:$4 sm:$0xff]   ;;  %v1974_v49 = vld [vmem:[%s2014_s2] sm:$0xf] }
  0x6e   :  { %539 = vmatprep.subr.bf16.mxu1 %v1546_v19  ;;  %v1605_v19 = vld [vmem:[#allocation6 + $0x16c] ss:$16 sps:$4 sm:$0xff]  }
  0x70   :  { %1055 = vmatpush1.bf16.msra.mxu0 %v1638_v52 }
  0x71   :  { %540 = vmatpush1.bf16.msra.mxu1 %v1548_v20  ;;  %1056 = vmatprep.subr.bf16.mxu0 %v1639_v53  ;;  %v1603_v20 = vld [vmem:[#allocation6 + $0x168] ss:$16 sps:$4 sm:$0xff]  }
  0x72   :  { %541 = vmatprep.subr.bf16.mxu1 %v1549_v21  ;;  %v1608_v21 = vld [vmem:[#allocation6 + $0x18c] ss:$16 sps:$4 sm:$0xff]  }
  0x74   :  { %1057 = vmatpush1.bf16.msra.mxu0 %v1641_v56 }
  0x75   :  { %542 = vmatpush1.bf16.msra.mxu1 %v1551_v22  ;;  %1058 = vmatprep.subr.bf16.mxu0 %v1642_v57  ;;  %v1606_v22 = vld [vmem:[#allocation6 + $0x188] ss:$16 sps:$4 sm:$0xff]  }
  0x76   :  { %543 = vmatprep.subr.bf16.mxu1 %v1552_v23  ;;  %v1611_v23 = vld [vmem:[#allocation6 + $0x1ac] ss:$16 sps:$4 sm:$0xff]  }
  0x78   :  { %1059 = vmatpush1.bf16.msra.mxu0 %v1644_v60 }
  0x79   :  { %544 = vmatpush1.bf16.msra.mxu1 %v1554_v24  ;;  %1060 = vmatprep.subr.bf16.mxu0 %v1645_v61  ;;  %v1609_v24 = vld [vmem:[#allocation6 + $0x1a8] ss:$16 sps:$4 sm:$0xff]  }
  0x7a   :  { %545 = vmatprep.subr.bf16.mxu1 %v1555_v25  ;;  %v1614_v25 = vld [vmem:[#allocation6 + $0x1cc] ss:$16 sps:$4 sm:$0xff]  }
  0x7c   :  { %1061 = vmatpush1.bf16.msra.mxu0 %v1647_v0 }
  0x7d   :  { %546 = vmatpush1.bf16.msra.mxu1 %v1557_v28  ;;  %1062 = vmatprep.subr.bf16.mxu0 %v1648_v1  ;;  %v1615_v28 = vld [vmem:[#allocation6 + $0x1e8] ss:$16 sps:$4 sm:$0xff]  }
  0x7e   :  { %547 = vmatprep.subr.bf16.mxu1 %v1558_v30  ;;  %v1660_v30 = vld [vmem:[#allocation8 + $0xe4] ss:$8 sps:$4 sm:$0xff]  }
  0x80   :  { %1063 = vmatpush1.bf16.msra.mxu0 %v1650_v4  ;;  %v1671_v4 = vld [vmem:[#allocation8 + $0x114] ss:$8 sps:$4 sm:$0xff]  }
  0x81   :  { %548 = vmatpush1.bf16.msra.mxu1 %v1560_v33  ;;  %1064 = vmatprep.subr.bf16.mxu0 %v1651_v5  ;;  %v1665_v33 = vld [vmem:[#allocation8 + $0xf0] ss:$8 sps:$4 sm:$0xff]  }
  0x82   :  { %549 = vmatprep.subr.bf16.mxu1 %v1561_v34  ;;  %v1668_v34 = vld [vmem:[#allocation8 + $0x104] ss:$8 sps:$4 sm:$0xff]   ;;  %v1669_v5 = vld [vmem:[#allocation8 + $0x110] ss:$8 sps:$4 sm:$0xff]  }
  0x84   :  { %1065 = vmatpush1.bf16.msra.mxu0 %v1653_v8  ;;  %v1677_v8 = vld [vmem:[#allocation8 + $0x134] ss:$8 sps:$4 sm:$0xff]  }
  0x85   :  { %550 = vmatpush1.bf16.msra.mxu1 %v1563_v37  ;;  %1066 = vmatprep.subr.bf16.mxu0 %v1654_v9  ;;  %v1716_v37 = vld [vmem:[#allocation9 + $0x48] sm:$0xff]   ;;  %v1675_v9 = vld [vmem:[#allocation8 + $0x130] ss:$8 sps:$4 sm:$0xff]  }
  0x86   :  { %551 = vmatprep.subr.bf16.mxu1 %v1564_v38  ;;  %v1717_v38 = vld [vmem:[#allocation9 + $0x8] sm:$0xff]  }
  0x88   :  { %1067 = vmatpush1.bf16.msra.mxu0 %v1656_v12  ;;  %v1683_v12 = vld [vmem:[#allocation8 + $0x154] ss:$8 sps:$4 sm:$0xff]  }
  0x89   :  { %552 = vmatpush1.bf16.msra.mxu1 %v1566_v41  ;;  %v1720_v41 = vld [vmem:[#allocation9 + $0x58] sm:$0xff]  }
  0x8a   :  { %564 = vmatprep.subr.bf16.mxu1 %v1572_v42  ;;  %v1721_v42 = vld [vmem:[#allocation9 + $0x18] sm:$0xff]  }
  0x8c   :  { %554 = vmatmul.mubr.bf16.vlgmr.msra.gmra.mrb[0].mxu1 %v1963_v44 }
  0x8d   :  { %565 = vmatpush1.bf16.msra.mxu1 %v1570_v46  ;;  %596 = vmatprep.mubr.bf16.mxu1 %v1960_v13  ;;  %v1657_v13 = vld [vmem:[#allocation8 + $0xd4] ss:$8 sps:$4 sm:$0xff]   ;;  %v89_v46 = vlaneseq }
  0x8e   :  { %566 = vmatprep.subr.bf16.mxu1 %v1575_v47  ;;  %1068 = vmatprep.subr.bf16.mxu0 %v1657_v13  ;;  %v1681_v13 = vld [vmem:[#allocation8 + $0x150] ss:$8 sps:$4 sm:$0xff]  }
  0x8f   :  { %1069 = vmatpush1.bf16.msra.mxu0 %v1659_v29  ;;  %v1968_v47 = vshrl.u32 %v89_v46, 7 }
  0x90   :  { %1070 = vmatprep.subr.bf16.mxu0 %v1660_v30 }
  0x91   :  { %567 = vmatpush1.bf16.msra.mxu1 %v1573_v50  ;;  %v91_v48 = vsub.s32 0, %v1968_v47  ;;  %v95_v50 = vsub.s32 1, %v1968_v47  ;;  %v99_v29 = vsub.s32 2, %v1968_v47  ;;  %v103_v30 = vsub.s32 3, %v1968_v47  ;;  %v1461_v47 = vld [vmem:[%s2018_s6] ss:$0 sm:$0xff] }
  0x92   :  { %568 = vmatprep.subr.bf16.mxu1 %v1578_v51 }
  0x93   :  { %1071 = vmatpush1.bf16.msra.mxu0 %v1662_v31  ;;  %v92_v51 = vrot.slane %v1974_v49, %v91_v48  ;;  %v96_v52 = vrot.slane %v1974_v49, %v95_v50  ;;  %v1705_v31 = vld [vmem:[#allocation8 + $0x1d0] ss:$8 sps:$4 sm:$0xff]  }
  0x94   :  { %1072 = vmatprep.subr.bf16.mxu0 %v1663_v32  ;;  %v100_v32 = vrot.slane %v1974_v49, %v99_v29 }
  0x95   :  { %569 = vmatpush1.bf16.msra.mxu1 %v1576_v54 }
  0x96   :  { %570 = vmatprep.subr.bf16.mxu1 %v1581_v55 }
  0x97   :  { %1073 = vmatpush1.bf16.msra.mxu0 %v1665_v33  ;;  %v1710_v33 = vld [vmem:[#allocation8 + $0x1e4] ss:$8 sps:$4 sm:$0xff]  }
  0x98   :  { %1085 = vmatprep.subr.bf16.mxu0 %v1668_v34  ;;  %v104_v34 = vrot.slane %v1974_v49, %v103_v30 }
  0x99   :  { %571 = vmatpush1.bf16.msra.mxu1 %v1579_v58 }
  0x9a   :  { %572 = vmatprep.subr.bf16.mxu1 %v1584_v59 }
  0x9d   :  { %573 = vmatpush1.bf16.msra.mxu1 %v1582_v62 }
  0x9e   :  { %574 = vmatprep.subr.bf16.mxu1 %v1587_v63 }
  0xa1   :  { %575 = vmatpush1.bf16.msra.mxu1 %v1585_v2 }
  0xa2   :  { %576 = vmatprep.subr.bf16.mxu1 %v1590_v3  ;;  %v1666_v3 = vld [vmem:[#allocation8 + $0x100] ss:$8 sps:$4 sm:$0xff]  }
  0xa5   :  { %577 = vmatpush1.bf16.msra.mxu1 %v1588_v6  ;;  %v1674_v6 = vld [vmem:[#allocation8 + $0x124] ss:$8 sps:$4 sm:$0xff]  }
  0xa6   :  { %578 = vmatprep.subr.bf16.mxu1 %v1593_v7  ;;  %v1672_v7 = vld [vmem:[#allocation8 + $0x120] ss:$8 sps:$4 sm:$0xff]  }
  0xa9   :  { %579 = vmatpush1.bf16.msra.mxu1 %v1591_v10  ;;  %v1680_v10 = vld [vmem:[#allocation8 + $0x144] ss:$8 sps:$4 sm:$0xff]  }
  0xaa   :  { %580 = vmatprep.subr.bf16.mxu1 %v1596_v11  ;;  %v1678_v11 = vld [vmem:[#allocation8 + $0x140] ss:$8 sps:$4 sm:$0xff]  }
  0xad   :  { %581 = vmatpush1.bf16.msra.mxu1 %v1594_v14  ;;  %v1686_v14 = vld [vmem:[#allocation8 + $0x164] ss:$8 sps:$4 sm:$0xff]  }
  0xae   :  { %582 = vmatprep.subr.bf16.mxu1 %v1599_v15  ;;  %v1684_v15 = vld [vmem:[#allocation8 + $0x160] ss:$8 sps:$4 sm:$0xff]  }
  0xb1   :  { %583 = vmatpush1.bf16.msra.mxu1 %v1597_v16  ;;  %v1689_v16 = vld [vmem:[#allocation8 + $0x174] ss:$8 sps:$4 sm:$0xff]  }
  0xb2   :  { %584 = vmatprep.subr.bf16.mxu1 %v1602_v17  ;;  %v1687_v17 = vld [vmem:[#allocation8 + $0x170] ss:$8 sps:$4 sm:$0xff]  }
  0xb5   :  { %585 = vmatpush1.bf16.msra.mxu1 %v1600_v18  ;;  %v1692_v18 = vld [vmem:[#allocation8 + $0x184] ss:$8 sps:$4 sm:$0xff]  }
  0xb6   :  { %586 = vmatprep.subr.bf16.mxu1 %v1605_v19  ;;  %v1690_v19 = vld [vmem:[#allocation8 + $0x180] ss:$8 sps:$4 sm:$0xff]  }
  0xb9   :  { %587 = vmatpush1.bf16.msra.mxu1 %v1603_v20  ;;  %v1695_v20 = vld [vmem:[#allocation8 + $0x194] ss:$8 sps:$4 sm:$0xff]  }
  0xba   :  { %588 = vmatprep.subr.bf16.mxu1 %v1608_v21  ;;  %v1693_v21 = vld [vmem:[#allocation8 + $0x190] ss:$8 sps:$4 sm:$0xff]  }
  0xbd   :  { %589 = vmatpush1.bf16.msra.mxu1 %v1606_v22  ;;  %v1698_v22 = vld [vmem:[#allocation8 + $0x1a4] ss:$8 sps:$4 sm:$0xff]  }
  0xbe   :  { %590 = vmatprep.subr.bf16.mxu1 %v1611_v23  ;;  %v1696_v23 = vld [vmem:[#allocation8 + $0x1a0] ss:$8 sps:$4 sm:$0xff]  }
  0xc1   :  { %591 = vmatpush1.bf16.msra.mxu1 %v1609_v24  ;;  %v1701_v24 = vld [vmem:[#allocation8 + $0x1b4] ss:$8 sps:$4 sm:$0xff]  }
  0xc2   :  { %592 = vmatprep.subr.bf16.mxu1 %v1614_v25  ;;  %v1699_v25 = vld [vmem:[#allocation8 + $0x1b0] ss:$8 sps:$4 sm:$0xff]  }
  0xc5   :  { %593 = vmatpush1.bf16.msra.mxu1 %v1612_v26  ;;  %v1704_v26 = vld [vmem:[#allocation8 + $0x1c4] ss:$8 sps:$4 sm:$0xff]  }
  0xc6   :  { %594 = vmatprep.subr.bf16.mxu1 %v1617_v27  ;;  %v1702_v27 = vld [vmem:[#allocation8 + $0x1c0] ss:$8 sps:$4 sm:$0xff]  }
  0xc9   :  { %595 = vmatpush1.bf16.msra.mxu1 %v1615_v28  ;;  %v1707_v28 = vld [vmem:[#allocation8 + $0x1d4] ss:$8 sps:$4 sm:$0xff]  }
  0xca   :  { %1478 = vmatprep.subr.bf16.mxu1 %v1714_v35 }
  0xcc   :  { %597 = vmatmul.mubr.bf16.vlgmr.msra.gmra.mrb[4].mxu1 %v1963_v44  ;;  %v1723_v44 = vld [vmem:[#allocation9 + $0x20] sm:$0xff]  }
  0xcd   :  { %1479 = vmatpush3.bf16.msra.mxu1 %v1715_v36  ;;  %v1708_v36 = vld [vmem:[#allocation8 + $0x1e0] ss:$8 sps:$4 sm:$0xff]  }
  0xce   :  { %1480 = vmatprep.subr.bf16.mxu1 %v1716_v37 }
  0xd1   :  { %1481 = vmatpush3.bf16.msra.mxu1 %v1717_v38 }
  0xd2   :  { %1482 = vmatprep.subr.bf16.mxu1 %v1718_v39  ;;  %v1713_v39 = vld [vmem:[#allocation8 + $0x1f4] ss:$8 sps:$4 sm:$0xff]  }
  0xd5   :  { %1483 = vmatpush3.bf16.msra.mxu1 %v1719_v40 }
  0xd6   :  { %1484 = vmatprep.subr.bf16.mxu1 %v1720_v41 }
  0xd9   :  { %1485 = vmatpush3.bf16.msra.mxu1 %v1721_v42 }
  0xda   :  { %1486 = vmatprep.subr.bf16.mxu1 %v1722_v43 }
  0xdd   :  { %1487 = vmatpush3.bf16.msra.mxu1 %v1723_v44 }
  0xde   :  { %1488 = vmatprep.subr.bf16.mxu1 %v1724_v45  ;;  %v1711_v45 = vld [vmem:[#allocation8 + $0x1f0] ss:$8 sps:$4 sm:$0xff]  }
 0x15f   :  { %v555_v53 = vpop.f32.mrb[0].mxu1 }
 0x160   :  { %v607_v54 = vadd.f32 %v555_v53, %v92_v51  ;;  %v557_v55 = vpop.f32.mrb[1].mxu1 }
 0x161   :  { %v608_v56 = vadd.f32 %v557_v55, %v96_v52  ;;  %v559_v57 = vpop.f32.mrb[2].mxu1  ;;  %v1725_v55 = vld [vmem:[#allocation9 + $0x28] sm:$0xff]  }
 0x162   :  { %v634_v58 = vmax.f32 %v607_v54, 0.0  ;;  %v611_v59 = vadd.f32 %v559_v57, %v92_v51  ;;  %v561_v60 = vpop.f32.mrb[3].mxu1  ;;  %1489 = vmatpush3.bf16.msra.mxu1 %v1725_v55  ;;  %v1727_v57 = vld [vmem:[#allocation9 + $0x30] sm:$0xff]  }
 0x163   :  { %v612_v61 = vadd.f32 %v561_v60, %v96_v52  ;;  %v635_v63 = vmax.f32 %v608_v56, 0.0  ;;  %v1726_v56 = vld [vmem:[#allocation9 + $0x70] sm:$0xff]  }
 0x164   :  { %v638_v62 = vmax.f32 %v611_v59, 0.0  ;;  %1490 = vmatprep.subr.bf16.mxu1 %v1726_v56  ;;  %v1729_v59 = vld [vmem:[#allocation9 + $0x38] sm:$0xff]   ;;  %v710_v60 = vld [vmem:[%s2016_s4] sm:$0x3] }
 0x165   :  { %v639_v0 = vmax.f32 %v612_v61, 0.0  ;;  %v715_v61 = vrot.slane %v710_v60, %v91_v48 }
 0x166   :  { %v642_v1 = vpack.c.bf16 %v638_v62, %v634_v58  ;;  %1491 = vmatpush3.bf16.msra.mxu1 %v1727_v57  ;;  %v1728_v58 = vld [vmem:[#allocation9 + $0x78] sm:$0xff]   ;;  %v719_v62 = vrot.slane %v710_v60, %v95_v50 }
 0x167   :  { %v643_v2 = vpack.c.bf16 %v639_v0, %v635_v63  ;;  %1492 = vmatprep.subr.bf16.mxu1 %v1728_v58 }
 0x169   :  { %1074 = vmatprep.mubr.bf16.mxu0 %v643_v2 }
 0x16a   :  { %1075 = vmatmul.mubr.bf16.vlgmr.msra.gmra.mrb[0].mxu0 %v642_v1  ;;  %1493 = vmatpush3.bf16.msra.mxu1 %v1729_v59 }
 0x16b   :  { %1086 = vmatpush1.bf16.msra.mxu0 %v1666_v3 }
 0x16c   :  { %1087 = vmatprep.subr.bf16.mxu0 %v1671_v4 }
 0x16f   :  { %1088 = vmatpush1.bf16.msra.mxu0 %v1669_v5 }
 0x170   :  { %1089 = vmatprep.subr.bf16.mxu0 %v1674_v6 }
 0x173   :  { %1090 = vmatpush1.bf16.msra.mxu0 %v1672_v7 }
 0x174   :  { %1091 = vmatprep.subr.bf16.mxu0 %v1677_v8 }
 0x177   :  { %1092 = vmatpush1.bf16.msra.mxu0 %v1675_v9 }
 0x178   :  { %1093 = vmatprep.subr.bf16.mxu0 %v1680_v10 }
 0x17b   :  { %1094 = vmatpush1.bf16.msra.mxu0 %v1678_v11 }
 0x17c   :  { %1095 = vmatprep.subr.bf16.mxu0 %v1683_v12 }
 0x17f   :  { %1096 = vmatpush1.bf16.msra.mxu0 %v1681_v13 }
 0x180   :  { %1097 = vmatprep.subr.bf16.mxu0 %v1686_v14 }
 0x183   :  { %1098 = vmatpush1.bf16.msra.mxu0 %v1684_v15 }
 0x184   :  { %1099 = vmatprep.subr.bf16.mxu0 %v1689_v16 }
 0x187   :  { %1100 = vmatpush1.bf16.msra.mxu0 %v1687_v17 }
 0x188   :  { %1101 = vmatprep.subr.bf16.mxu0 %v1692_v18 }
 0x18b   :  { %1102 = vmatpush1.bf16.msra.mxu0 %v1690_v19 }
 0x18c   :  { %1103 = vmatprep.subr.bf16.mxu0 %v1695_v20 }
 0x18f   :  { %1104 = vmatpush1.bf16.msra.mxu0 %v1693_v21 }
 0x190   :  { %1105 = vmatprep.subr.bf16.mxu0 %v1698_v22 }
 0x193   :  { %1106 = vmatpush1.bf16.msra.mxu0 %v1696_v23 }
 0x194   :  { %1107 = vmatprep.subr.bf16.mxu0 %v1701_v24 }
 0x197   :  { %1108 = vmatpush1.bf16.msra.mxu0 %v1699_v25 }
 0x198   :  { %1109 = vmatprep.subr.bf16.mxu0 %v1704_v26 }
 0x19b   :  { %1110 = vmatpush1.bf16.msra.mxu0 %v1702_v27 }
 0x19c   :  { %1111 = vmatprep.subr.bf16.mxu0 %v1707_v28 }
 0x19f   :  { %v598_v35 = vpop.f32.mrb[4].mxu1  ;;  %1112 = vmatpush1.bf16.msra.mxu0 %v1705_v31 }
 0x1a0   :  { %v609_v37 = vadd.f32 %v598_v35, %v100_v32  ;;  %v600_v38 = vpop.f32.mrb[5].mxu1  ;;  %1113 = vmatprep.subr.bf16.mxu0 %v1710_v33 }
 0x1a1   :  { %v610_v40 = vadd.f32 %v600_v38, %v104_v34  ;;  %v602_v41 = vpop.f32.mrb[6].mxu1 }
 0x1a2   :  { %v613_v42 = vadd.f32 %v602_v41, %v100_v32  ;;  %v604_v43 = vpop.f32.mrb[7].mxu1  ;;  %v636_v46 = vmax.f32 %v609_v37, 0.0 }
 0x1a3   :  { %v614_v44 = vadd.f32 %v604_v43, %v104_v34  ;;  %1114 = vmatpush1.bf16.msra.mxu0 %v1708_v36  ;;  %v637_v52 = vmax.f32 %v610_v40, 0.0 }
 0x1a4   :  { %v640_v51 = vmax.f32 %v613_v42, 0.0  ;;  %1115 = vmatprep.subr.bf16.mxu0 %v1713_v39 }
 0x1a5   :  { %v641_v53 = vmax.f32 %v614_v44, 0.0 }
 0x1a6   :  { %v644_v49 = vpack.c.bf16 %v640_v51, %v636_v46 }
 0x1a7   :  { %v645_v54 = vpack.c.bf16 %v641_v53, %v637_v52  ;;  %1116 = vmatpush1.bf16.msra.mxu0 %v1711_v45 }
 0x1a9   :  { %1117 = vmatprep.mubr.bf16.mxu0 %v645_v54 }
 0x1aa   :  { %1118 = vmatmul.mubr.bf16.vlgmr.msra.gmra.mrb[0].mxu0 %v644_v49 }
 0x27d   :  { %v1119_v63 = vpop.f32.mrb[0].mxu0 }
 0x27e   :  { %v1500_v0 = vadd.f32 %v1119_v63, %v715_v61  ;;  %v1121_v1 = vpop.f32.mrb[1].mxu0 }
 0x27f   :  { %v1501_v2 = vadd.f32 %v1121_v1, %v719_v62  ;;  %v1123_v3 = vpop.f32.mrb[2].mxu0 }
 0x280   :  { %v1502_v4 = vadd.f32 %v1123_v3, %v715_v61  ;;  %v1125_v5 = vpop.f32.mrb[3].mxu0  ;;  %v1128_v7 = vmax.f32 %v1500_v0, 0.0 }
 0x281   :  { %v1503_v6 = vadd.f32 %v1125_v5, %v719_v62  ;;  %v1129_v9 = vmax.f32 %v1501_v2, 0.0 }
 0x282   :  { %v1130_v8 = vmax.f32 %v1502_v4, 0.0 }
 0x283   :  { %v1131_v10 = vmax.f32 %v1503_v6, 0.0 }
 0x284   :  { %v1132_v11 = vpack.c.bf16 %v1130_v8, %v1128_v7 }
 0x285   :  { %v1133_v12 = vpack.c.bf16 %v1131_v10, %v1129_v9 }
 0x287   :  { %1301 = vmatprep.mubr.bf16.mxu1 %v1133_v12 }
 0x288   :  { %1302 = vmatmul.mubr.bf16.vlgmr.msra.gmra.mrb[8].mxu1 %v1132_v11 }
 0x35b   :  { %v1494_v48 = vpop.f32.mrb[8].mxu1 }
 0x35c   :  { %v1495_v50 = vpop.f32.mrb[9].mxu1 }
 0x35d   :  { %v1496_v13 = vadd.f32 %v1495_v50, %v1494_v48  ;;  %v1497_v14 = vpop.f32.mrb[10].mxu1 }
 0x35e   :  { %v1498_v15 = vpop.f32.mrb[11].mxu1 }
 0x35f   :  { %v1304_v16 = vadd.f32 %v1496_v13, %v1461_v47  ;;  %v1499_v17 = vadd.f32 %v1498_v15, %v1497_v14 }
 0x361   :  { %1310 = vst [vmem:[#allocation11] sm:$0xff] %v1304_v16  ;;  %v1307_v18 = vadd.f32 %v1499_v17, %v1461_v47 }
 0x363   :  { %1311 = vst [vmem:[#allocation11 + $0x8] sm:$0xff] %v1307_v18 }
 0x364   :  { %1829 = shalt.err (!%p1826_p8)
}
 0x365   :  { %s1830_s14 = scalar_lea.hbm %s2019_s7, 256 }
 0x366   :  { %p1831_p9 = scmp.ne.s32.totalorder %s2019_s7, %s1830_s14  ;;  %p1834_p10 = scmp.lt.u32.totalorder %s1830_s14, %s2019_s7 }
 0x368   :  { %p1836_p11 = pnand %p1834_p10, %p1831_p9 }
 0x36a   :  { %1839 = shalt.err (!%p1836_p11)
}
 0x36b   :  { %1323 = dma.vmem_to_hbm [thread:$0]  %s1318_s11, 256, %s2019_s7, [#allocation5], %s1852_s1, %s1852_s1, %s1853_s25  }
 0x36c   :  { %1846 = dma.done.wait [#allocation5], 256  }
 0x36d   :  { %1847 = vsyncadd [#allocation5], 4294967040 }
 0x36e   :  { %1327 = vsyncpa [#allocation4], 1 }
 0x36f   :  { %1328 = vsyncpa [#allocation7], 1 }
 0x370   :  { %1329 = vsyncpa [#allocation10], 1 }
 0x371   :  { %1330 = vsyncpa [#allocation5], 1 }

</bundles_post_ra>
